<compile_context>
chip_gen: v5e
topology: v5e:2x2
jax: 0.10.0
libtpu: 0.0.40
codegen_flags: <defaults>
</compile_context>

<pallas_src>
import functools

import jax
import jax.numpy as jnp
from jax.experimental import pallas as pl
from jax.experimental.pallas import tpu as pltpu

_LOSS_TYPES = ("log_sum", "sum_log", "sum_log_nce", "max_min")


# ---------------------------------------------------------------------------
# Kernel: one (TB, C) batch tile -> one partial loss.
# ---------------------------------------------------------------------------
def _multilabel_loss_kernel(logits_ref, mask_ref, out_ref, *,
                            type_loss, tb, batch_size):
    # Upcast in VMEM; HBM streams stay bf16/int8.  (Math stays f32, which is
    # also required on v5e where VPU/EUP have no bf16 path.)
    logits = logits_ref[...].astype(jnp.float32)            # (TB, C)
    mask = mask_ref[...] != 0                                # (TB, C) bool

    # Shared row-wise max / exp, reused by every branch that needs a
    # logsumexp over the candidate axis (halves EUP exp work for log_sum).
    # All inputs here are finite, so no isfinite guards are needed.
    m_all = jnp.max(logits, axis=-1, keepdims=True)          # (TB, 1)
    e_all = jnp.exp(logits - m_all)                          # (TB, C)
    sum_all = jnp.sum(e_all, axis=-1, keepdims=True)         # (TB, 1)
    all_lse = jnp.log(sum_all) + m_all                       # (TB, 1)

    if type_loss == "log_sum":
        # exp(-10000 - m_all) underflows to 0 in f32, so masking the shared
        # exp reproduces the reference's -10000 sentinel (rows are assumed to
        # have >= 1 positive, as in the PyTorch usage).
        sum_gold = jnp.sum(jnp.where(mask, e_all, 0.0), axis=-1, keepdims=True)
        gold_log_probs = jnp.log(sum_gold) + m_all - all_lse
    elif type_loss == "max_min":
        min_gold = jnp.min(jnp.where(mask, logits, 10000.0), axis=-1,
                           keepdims=True)
        gold_log_probs = min_gold - all_lse
    elif type_loss == "sum_log":
        # NOTE: like the PyTorch reference, a row with zero positives would
        # produce inf/nan here (parity, not a kernel bug).
        num_pos = jnp.sum(mask.astype(jnp.float32), axis=-1, keepdims=True)
        gold_sum = jnp.sum(jnp.where(mask, logits, 0.0), axis=-1,
                           keepdims=True)
        gold_log_probs = gold_sum / num_pos - all_lse
    else:  # sum_log_nce
        gold_sum = jnp.sum(jnp.where(mask, logits, 0.0), axis=-1,
                           keepdims=True)
        # Sum of exp over negatives, expressed in the shared m_all frame.
        neg_sum = jnp.sum(jnp.where(mask, 0.0, e_all), axis=-1, keepdims=True)
        # logaddexp(logits, neg_lse) == m_all + log(e_all + neg_sum):
        # one log per element instead of exp + log1p per element.  Handles the
        # "no negatives" row (neg_sum == 0 -> norm_elem == logits) exactly
        # like the reference's logaddexp(x, -inf) == x.
        norm_elem = m_all + jnp.log(e_all + neg_sum)          # (TB, C)
        norm_term = jnp.sum(jnp.where(mask, norm_elem, 0.0), axis=-1,
                            keepdims=True)
        gold_log_probs = gold_sum - norm_term

    row_loss = -gold_log_probs                                # (TB, 1)

    # Zero out rows that only exist because B was padded up to a TB multiple.
    row_idx = (pl.program_id(0) * tb
               + jax.lax.broadcasted_iota(jnp.int32, (tb, 1), 0))
    row_loss = jnp.where(row_idx < batch_size, row_loss, 0.0)

    tile_loss = jnp.sum(row_loss)
    # Lane-dense full-vreg store of the tile's partial loss; the wrapper reads
    # [:, 0, 0] and finishes the reduction (keeps the grid axis "parallel").
    out_ref[...] = jnp.full((1, 8, 128), tile_loss, dtype=jnp.float32)


# ---------------------------------------------------------------------------
# Wrapper
# ---------------------------------------------------------------------------
def _round_up(x, m):
    return ((x + m - 1) // m) * m


def _choose_tb(B, C, logits_itemsize):
    """Batch-tile size: ~2 MiB of narrow-dtype input per tile.

    With double-buffered inputs plus the f32 working set this stays well
    inside the default scoped-VMEM limit on v5e (16 MiB), v6e (32 MiB) and
    v7x (32 MiB scoped / 64 MiB physical).
    """
    per_row_bytes = C * (logits_itemsize + 1)   # logits stream + int8 mask
    budget = 2 * 1024 * 1024
    tb = budget // max(per_row_bytes, 1)
    tb = max(32, (tb // 32) * 32)               # 32 = int8 sublane packing
    if tb >= B:
        tb = _round_up(max(B, 1), 8)            # single tile == full padded array
    return tb


def multilabel_loss(logits, label_marks, type_loss, reduction="sum", tb=None):
    assert type_loss in _LOSS_TYPES
    B, C = logits.shape

    # Keep the logits HBM stream in its native dtype (bf16 stays bf16); the
    # kernel upcasts inside VMEM.  The mask travels as int8.
    mask_i8 = (label_marks != 0).astype(jnp.int8)

    if tb is None:
        tb = _choose_tb(B, C, jnp.dtype(logits.dtype).itemsize)
    else:
        tb = _round_up(tb, 8)
    B_pad = _round_up(B, tb)
    if B_pad != B:
        logits = jnp.pad(logits, ((0, B_pad - B), (0, 0)))
        mask_i8 = jnp.pad(mask_i8, ((0, B_pad - B), (0, 0)))
    num_tiles = B_pad // tb

    kernel = functools.partial(_multilabel_loss_kernel, type_loss=type_loss,
                               tb=tb, batch_size=B)
    partials = pl.pallas_call(
        kernel,
        out_shape=jax.ShapeDtypeStruct((num_tiles, 8, 128), jnp.float32),
        grid=(num_tiles,),
        in_specs=[
            pl.BlockSpec((tb, C), lambda i: (i, 0)),
            pl.BlockSpec((tb, C), lambda i: (i, 0)),
        ],
        out_specs=pl.BlockSpec((1, 8, 128), lambda i: (i, 0, 0)),
        compiler_params=pltpu.CompilerParams(
            dimension_semantics=("parallel",)),
    )(logits, mask_i8)

    loss = jnp.sum(partials[:, 0, 0])
    if reduction == "mean":
        loss = loss / jnp.float32(B)
    return loss


class MultiLabelLoss:
    """JAX/Pallas port of taco MultiLabelLoss (forward only)."""

    def __init__(self, type_loss, reduction="sum"):
        assert type_loss in _LOSS_TYPES
        self.type_loss = type_loss
        self.reduction = reduction

    def __call__(self, logits, label_marks):
        return multilabel_loss(logits, label_marks, self.type_loss,
                               self.reduction)


# ---------------------------------------------------------------------------
# Pure-JAX reference (mirrors the PyTorch code) used for verification.
# ---------------------------------------------------------------------------
def _reference_loss(logits, mask, type_loss, reduction="sum"):
    logits = logits.astype(jnp.float32)
    mask_b = mask.astype(bool)
    if type_loss == "log_sum":
        gold = jnp.where(mask_b, logits, -10000.0)
        glp = jax.nn.logsumexp(gold, -1) - jax.nn.logsumexp(logits, -1)
    elif type_loss == "max_min":
        gold = jnp.where(mask_b, logits, 10000.0)
        glp = jnp.min(gold, -1) - jax.nn.logsumexp(logits, -1)
    elif type_loss == "sum_log":
        num_pos = jnp.sum(mask_b, -1)
        gold_sum = jnp.sum(jnp.where(mask_b, logits, 0.0), -1)
        glp = gold_sum / num_pos - jax.nn.logsumexp(logits, -1)
    else:  # sum_log_nce
        gold_sum = jnp.sum(jnp.where(mask_b, logits, 0.0), -1)
        neg = jnp.where(mask_b, -jnp.inf, logits)
        neg_lse = jax.nn.logsumexp(neg, -1, keepdims=True)
        norm = jnp.sum(jnp.where(mask_b, jnp.logaddexp(logits, neg_lse), 0.0),
                       -1)
        glp = gold_sum - norm
    loss = -jnp.sum(glp)
    if reduction == "mean":
        loss = loss / logits.shape[0]
    return loss


if __name__ == "__main__":
    key = jax.random.PRNGKey(0)
    k1, k2, k3, k4 = jax.random.split(key, 4)

    ok = True

    # Case 1: small single-tile case (B=8, C=16).
    B, C = 8, 16
    logits = jax.random.normal(k1, (B, C), dtype=jnp.float32)
    mask = (jax.random.uniform(k2, (B, C)) < 0.3).astype(jnp.int32)
    mask = mask.at[:, 0].set(1)     # >= 1 positive per row
    mask = mask.at[:, -1].set(0)    # >= 1 negative per row
    for type_loss in _LOSS_TYPES:
        for reduction in ("sum", "mean"):
            loss_fn = MultiLabelLoss(type_loss, reduction)
            got = jax.block_until_ready(loss_fn(logits, mask))
            ref = _reference_loss(logits, mask, type_loss, reduction)
            if not jnp.allclose(got, ref, rtol=5e-4, atol=1e-3):
                ok = False
                print(f"MISMATCH {type_loss}/{reduction}: {got} vs {ref}")

    # Case 2: multi-tile case (B=40, C=128, TB=32 -> 2 tiles + row padding),
    # exercises the batch grid, the int8 mask tiles and the validity mask.
    B2, C2 = 40, 128
    logits2 = jax.random.normal(k3, (B2, C2), dtype=jnp.float32)
    mask2 = (jax.random.uniform(k4, (B2, C2)) < 0.2).astype(jnp.int32)
    mask2 = mask2.at[:, 0].set(1)
    mask2 = mask2.at[:, -1].set(0)
    for type_loss in _LOSS_TYPES:
        got = jax.block_until_ready(
            multilabel_loss(logits2, mask2, type_loss, "sum", tb=32))
        ref = _reference_loss(logits2, mask2, type_loss, "sum")
        if not jnp.allclose(got, ref, rtol=5e-4, atol=1e-3):
            ok = False
            print(f"MISMATCH multi-tile {type_loss}: {got} vs {ref}")

    # Case 3: bf16 logits HBM stream (kernel upcasts to f32 in VMEM).
    logits2_bf16 = logits2.astype(jnp.bfloat16)
    ref_in = logits2_bf16.astype(jnp.float32)
    for type_loss in _LOSS_TYPES:
        got = jax.block_until_ready(
            multilabel_loss(logits2_bf16, mask2, type_loss, "sum", tb=32))
        ref = _reference_loss(ref_in, mask2, type_loss, "sum")
        if not jnp.allclose(got, ref, rtol=1e-3, atol=1e-2):
            ok = False
            print(f"MISMATCH bf16 {type_loss}: {got} vs {ref}")

    if ok:
        print("KERNEL_OK")
</pallas_src>

<mosaic_0001>
module attributes {stable_mosaic.version = 11 : i64} {
  func.func @_multilabel_loss_kernel(%arg0: i32, %arg1: memref<8x16xf32, #tpu.memory_space<vmem>>, %arg2: memref<8x16xi8, #tpu.memory_space<vmem>>, %arg3: memref<1x8x128xf32, #tpu.memory_space<vmem>>) attributes {dimension_semantics = [#tpu.dimension_semantics<parallel>], iteration_bounds = array<i64: 1>, scalar_prefetch = 0 : i64, scratch_operands = 0 : i64, tpu.core_type = #tpu.core_type<tc>, window_params = [{transform_indices = @transform_0, window_bounds = array<i64: 8, 16>}, {transform_indices = @transform_1, window_bounds = array<i64: 8, 16>}, {transform_indices = @transform_2, window_bounds = array<i64: 1, 8, 128>}]} {
    %c0 = arith.constant 0 : index
    %c0_0 = arith.constant 0 : index
    %0 = vector.load %arg1[%c0, %c0_0] : memref<8x16xf32, #tpu.memory_space<vmem>>, vector<8x16xf32>
    %c0_1 = arith.constant 0 : index
    %c0_2 = arith.constant 0 : index
    %1 = vector.load %arg2[%c0_1, %c0_2] : memref<8x16xi8, #tpu.memory_space<vmem>>, vector<8x16xi8>
    %c0_i8 = arith.constant 0 : i8
    %2 = vector.broadcast %c0_i8 : i8 to vector<8x16xi8>
    %3 = arith.cmpi ne, %1, %2 : vector<8x16xi8>
    %cst = arith.constant dense<0xFF800000> : vector<8xf32>
    %4 = vector.multi_reduction <maximumf>, %0, %cst [1] : vector<8x16xf32> to vector<8xf32>
    %5 = vector.shape_cast %4 : vector<8xf32> to vector<8x1xf32>
    %6 = vector.broadcast %5 : vector<8x1xf32> to vector<8x16xf32>
    %7 = arith.subf %0, %6 : vector<8x16xf32>
    %8 = math.exp %7 : vector<8x16xf32>
    %cst_3 = arith.constant dense<0.000000e+00> : vector<8xf32>
    %9 = vector.multi_reduction <add>, %8, %cst_3 [1] : vector<8x16xf32> to vector<8xf32>
    %10 = vector.shape_cast %9 : vector<8xf32> to vector<8x1xf32>
    %11 = math.log %10 : vector<8x1xf32>
    %12 = arith.addf %11, %5 : vector<8x1xf32>
    %cst_4 = arith.constant 0.000000e+00 : f32
    %13 = vector.broadcast %cst_4 : f32 to vector<8x16xf32>
    %14 = arith.select %3, %8, %13 : vector<8x16xi1>, vector<8x16xf32>
    %cst_5 = arith.constant dense<0.000000e+00> : vector<8xf32>
    %15 = vector.multi_reduction <add>, %14, %cst_5 [1] : vector<8x16xf32> to vector<8xf32>
    %16 = vector.shape_cast %15 : vector<8xf32> to vector<8x1xf32>
    %17 = math.log %16 : vector<8x1xf32>
    %18 = arith.addf %17, %5 : vector<8x1xf32>
    %19 = arith.subf %18, %12 : vector<8x1xf32>
    %cst_6 = arith.constant 0.000000e+00 : f32
    %20 = vector.broadcast %cst_6 : f32 to vector<8x1xf32>
    %21 = arith.subf %20, %19 : vector<8x1xf32>
    %c8_i32 = arith.constant 8 : i32
    %22 = arith.muli %arg0, %c8_i32 : i32
    %23 = tpu.iota {dimensions = array<i32: 0>} : vector<8x1xi32>
    %24 = vector.broadcast %22 : i32 to vector<8x1xi32>
    %25 = arith.addi %24, %23 : vector<8x1xi32>
    %c8_i32_7 = arith.constant 8 : i32
    %26 = vector.broadcast %c8_i32_7 : i32 to vector<8x1xi32>
    %27 = arith.cmpi slt, %25, %26 : vector<8x1xi32>
    %cst_8 = arith.constant 0.000000e+00 : f32
    %28 = vector.broadcast %cst_8 : f32 to vector<8x1xf32>
    %29 = arith.select %27, %21, %28 : vector<8x1xi1>, vector<8x1xf32>
    %30 = vector.shape_cast %29 : vector<8x1xf32> to vector<1x8x1xf32>
    %cst_9 = arith.constant dense<0.000000e+00> : vector<1xf32>
    %31 = vector.multi_reduction <add>, %30, %cst_9 [1, 2] : vector<1x8x1xf32> to vector<1xf32>
    %32 = vector.shape_cast %31 : vector<1xf32> to vector<1x1x1xf32>
    %33 = vector.extract %32[0, 0, 0] : f32 from vector<1x1x1xf32>
    %34 = vector.broadcast %33 : f32 to vector<1x8x128xf32>
    %c0_10 = arith.constant 0 : index
    %c0_11 = arith.constant 0 : index
    %c0_12 = arith.constant 0 : index
    %35 = vector.load %arg3[%c0_10, %c0_11, %c0_12] : memref<1x8x128xf32, #tpu.memory_space<vmem>>, vector<1x8x128xf32>
    tpu.vector_store %arg3[%c0_10, %c0_11, %c0_12], %34 {strides = array<i32>} : memref<1x8x128xf32, #tpu.memory_space<vmem>>, vector<1x8x128xf32>,
    return
  }
  func.func @transform_0(%arg0: i32) -> (i32, i32) {
    %c0_i32 = arith.constant 0 : i32
    %c0_i32_0 = arith.constant 0 : i32
    return %arg0, %c0_i32 : i32, i32
  }
  func.func @transform_1(%arg0: i32) -> (i32, i32) {
    %c0_i32 = arith.constant 0 : i32
    %c0_i32_0 = arith.constant 0 : i32
    return %arg0, %c0_i32 : i32, i32
  }
  func.func @transform_2(%arg0: i32) -> (i32, i32, i32) {
    %c0_i32 = arith.constant 0 : i32
    %c0_i32_0 = arith.constant 0 : i32
    %c0_i32_1 = arith.constant 0 : i32
    return %arg0, %c0_i32, %c0_i32_0 : i32, i32, i32
  }
}

</mosaic_0001>

<bundles_post_ra>
// kernel: tpu_custom_call.1
= control target key start
LH: loop header
LB: loop body
LE: loop exit
PB: predicated region body
PF: predicated region fallthrough
CT: control target
= control target key end

     0   :  { %7 = vsyncpa [#allocation3], 0  ;;  %s229_s0 = inlined_call_operand.hbm [shape: f32[8,16], index: 0, kind: input, shape index: {}]   ;;  %s230_s1 = inlined_call_operand.hbm [shape: s8[8,16], index: 1, kind: input, shape index: {}]   ;;  %s231_s2 = inlined_call_operand.hbm [shape: f32[1,8,128], index: 2, kind: output, shape index: {}]  }
   0x1   :  { %8 = vsyncpa [#allocation6], 0 }
   0x2   :  { %9 = vsyncpa [#allocation4], 0  ;;  %s15_s11 = sshll.u32 %s229_s0, 4  ;;  %s198_s12 = smov [#allocation2]   ;;  %s16_s11 = int_to_ptr.hbm [resolvable:$true] %s15_s11 }
   0x3   :  { %s17_s13 = sshll.u32 %s198_s12, 4  ;;  %s26_s16 = sshll.u32 %s230_s1, 4  ;;  %s18_s13 = int_to_ptr.vmem [resolvable:$true] %s17_s13  ;;  %s27_s16 = int_to_ptr.hbm [resolvable:$true] %s26_s16 }
   0x4   :  { %20 = dma.hbm_to_vmem [thread:$0]  %s16_s11, 128, %s18_s13, [#allocation3]  }
   0x5   :  { %s199_s17 = smov [#allocation5]  }
   0x6   :  { %s28_s18 = sshll.u32 %s199_s17, 4  ;;  %s29_s18 = int_to_ptr.vmem [resolvable:$true] %s28_s18 }
   0x7   :  { %31 = dma.hbm_to_vmem [thread:$0]  %s27_s16, 32, %s29_s18, [#allocation6]  }
   0x8   :  { %192 = dma.done.wait [#allocation3], 128  }
   0x9   :  { %193 = vsyncadd [#allocation3], 4294967168 }
   0xa   :  { %194 = dma.done.wait [#allocation6], 32  }
   0xb   :  { %195 = vsyncadd [#allocation6], 4294967264  ;;  %vm45_vm0 = vcmask 130048   ;;  %v42_v0 = vld [vmem:[#allocation2] sm:$0xff]  ;;  %v43_v2 = vld [vmem:[#allocation5] sm:$0x3] }
   0xc   :  { %v46_v1 = vsel %vm45_vm0, %v42_v0, -inf  ;;  %vm44_vm1 = vnez %v43_v2  ;;  %v200_v5 = vmov 0   ;;  %vm77_vm3 = vcmask 7168   ;;  %s201_s0 = smov [#allocation7]   ;;  %s97_s21 = sshll.u32 %s231_s2, 4  ;;  %s98_s21 = int_to_ptr.hbm [resolvable:$true] %s97_s21 }
   0xd   :  { %47 = vmax.xlane.f32.xlu0 %v46_v1  ;;  %v58_v6 = vsel %vm44_vm1, 16843009, %v200_v5  ;;  %s95_s1 = sshll.u32 %s201_s0, 4  ;;  %s96_s1 = int_to_ptr.vmem [resolvable:$true] %s95_s1 }
   0xe   :  { %v59_v8 = vunpack.c.0.s8 %v58_v6 }
  0x10   :  { %vm60_vm2 = vcmp.ne.s32.totalorder %v59_v8, 0 }
  0x80   :  { %v48_v3 = vpop.xlane.xlu0 %47 }
  0x81   :  { %v49_v4 = vsub.f32 %v42_v0, %v48_v3 }
  0x83   :  { %v50_v7 = vmul.f32 1.442695, %v49_v4 }
  0x85   :  { %114 = vpow2.f32 %v50_v7 }
  0x8b   :  { %v115_v9 = vpop.eup %114 }
  0x8c   :  { %v52_v10 = vsel %vm45_vm0, %v115_v9, 0.0  ;;  %v61_v11 = vsel %vm60_vm2, %v115_v9, 0.0 }
  0x8d   :  { %53 = vadd.xlane.f32.xlu0 %v52_v10  ;;  %v62_v12 = vsel %vm45_vm0, %v61_v11, 0.0 }
  0x8e   :  { %63 = vadd.xlane.f32.xlu1 %v62_v12 }
 0x100   :  { %v54_v13 = vpop.xlane.xlu0 %53 }
 0x101   :  { %116 = vlog2.f32 %v54_v13  ;;  %v64_v14 = vpop.xlane.xlu1 %63 }
 0x102   :  { %118 = vlog2.f32 %v64_v14 }
 0x107   :  { %v117_v15 = vpop.eup %116 }
 0x108   :  { %v119_v16 = vpop.eup %118  ;;  %v56_v17 = vmul.f32 0.6931472, %v117_v15 }
 0x109   :  { %v66_v18 = vmul.f32 0.6931472, %v119_v16 }
 0x10a   :  { %v57_v19 = vadd.f32 %v56_v17, %v48_v3 }
 0x10b   :  { %v67_v20 = vadd.f32 %v66_v18, %v48_v3 }
 0x10d   :  { %v68_v21 = vsub.f32 %v67_v20, %v57_v19 }
 0x10f   :  { %v69_v22 = vsub.f32 0.0, %v68_v21 }
 0x111   :  { %v78_v23 = vsel %vm77_vm3, %v69_v22, 0.0 }
 0x112   :  { %79 = vadd.xlane.f32.xlu1 %v78_v23 }
 0x185   :  { %v80_v24 = vpop.xlane.xlu1 %79 }
 0x186   :  { %v81_v25 = vrot.slane %v80_v24, 4 }
 0x188   :  { %v82_v26 = vadd.f32 %v81_v25, %v80_v24 }
 0x18a   :  { %v83_v27 = vrot.slane %v82_v26, 2 }
 0x18c   :  { %v84_v28 = vadd.f32 %v83_v27, %v82_v26 }
 0x18e   :  { %v85_v29 = vrot.slane %v84_v28, 1 }
 0x190   :  { %v86_v30 = vadd.f32 %v85_v29, %v84_v28 }
 0x192   :  { %108 = vpush %v86_v30 }
 0x1c3   :  { %s109_s22 = spop %108 }
 0x1c4   :  { %v88_v31 = vstv %s109_s22 }
 0x1c5   :  { %89 = vst [vmem:[#allocation7] sm:$0xff] %v88_v31 }
 0x1c6   :  { %100 = dma.vmem_to_hbm [thread:$0]  %s96_s1, 128, %s98_s21, [#allocation4]  }
 0x1c7   :  { %196 = dma.done.wait [#allocation4], 128  }
 0x1c8   :  { %197 = vsyncadd [#allocation4], 4294967168 }
 0x1c9   :  { %105 = vsyncpa [#allocation3], 1 }
 0x1ca   :  { %106 = vsyncpa [#allocation6], 1 }
 0x1cb   :  { %107 = vsyncpa [#allocation4], 1 }

</bundles_post_ra>
